<compile_context>
chip_gen: v7x
topology: tpu7x:2x2x1
jax: 0.10.0
libtpu: 0.0.40
codegen_flags: <defaults>
</compile_context>

<pallas_src>
import functools
import numpy as np
import jax
import jax.numpy as jnp
from jax import lax
from jax.experimental import pallas as pl
from jax.experimental.pallas import tpu as pltpu


def _round_up(a, m):
    return -(-int(a) // int(m)) * int(m)


def _const_block_spec(block_shape, index_map):
    """BlockSpec for an operand whose block never changes across the grid: single-buffered
    (halves its VMEM footprint) when the installed Pallas supports pipeline_mode."""
    try:
        return pl.BlockSpec(block_shape, index_map, pipeline_mode=pl.Buffered(1))
    except Exception:                                    # pragma: no cover - older API fallback
        return pl.BlockSpec(block_shape, index_map)


def _conv_bn_relu_pool_kernel(x_ref, w_ref, scale_ref, shift_ref, o_ref, *,
                              kh_size, stride_t, conv_rows, pool_k, pool_w,
                              fpo_cout_pad, t_out_valid, n_t, apply_scale,
                              needs_row_mask):
    """One (batch, T-tile) step: im2col matmul conv + folded BN + ReLU + fused ceil-mode pool.

    x_ref:    (rows_in, K_pad)           halo'd input window (compute dtype)
    w_ref:    (KH*K_pad, wcols)          im2col weight, BN scale optionally folded in
    scale/shift: (1, wcols) f32          per-output-column epilogue scale / shift
    o_ref:    (tTp, fpo_cout_pad)        pooled, lane-dense output tile
    """
    # ---- single fused im2col matmul: lane-concat the KH shifted row windows ----
    if stride_t == 1:
        parts = [x_ref[kh:kh + conv_rows, :] for kh in range(kh_size)]
    else:
        parts = [x_ref[pl.ds(kh, conv_rows, stride=stride_t), :] for kh in range(kh_size)]
    lhs = parts[0] if kh_size == 1 else jnp.concatenate(parts, axis=1)
    acc = jnp.dot(lhs, w_ref[...], preferred_element_type=jnp.float32)

    if apply_scale:                                   # bf16 path: keep BN scale in f32 epilogue
        acc = acc * scale_ref[...]
    y = jnp.maximum(acc + shift_ref[...], 0.0)        # folded conv-bias / BN shift + ReLU

    def pool_and_store(v):
        if pool_k > 1:                                # pool over T (sublane dim)
            v = v.reshape(conv_rows // pool_k, pool_k, v.shape[-1]).max(axis=1)
        if pool_w > 1:                                # pool over F: contiguous 128-aligned lane slabs
            v = functools.reduce(
                jnp.maximum,
                [v[:, j * fpo_cout_pad:(j + 1) * fpo_cout_pad] for j in range(pool_w)])
        o_ref[...] = v.astype(o_ref.dtype)            # unmasked lane-dense store

    if needs_row_mask:
        # Only the last T-tile of a batch element can contain conv rows >= T_out; gate the mask
        # there so every other grid step skips the full-tile compare+select.
        ti = pl.program_id(0) % n_t
        is_last = ti == (n_t - 1)

        @pl.when(ti != (n_t - 1))
        def _():
            pool_and_store(y)

        @pl.when(is_last)
        def _():
            # Zero conv rows >= T_out before max-pooling.  Safe ONLY because ReLU makes every
            # real row >= 0 and every ceil-mode pool window contains at least one real row.
            rows = lax.broadcasted_iota(jnp.int32, (conv_rows, 1), 0)
            pool_and_store(jnp.where(rows < (t_out_valid - ti * conv_rows), y, 0.0))
    else:
        pool_and_store(y)


def _build_weights(w, scale, shift, *, stride_f, pad_f, F, F_out, F_po, pool_w,
                   Cin, K_pad, fpo_cout_pad, fold_scale):
    """im2col weight (KH*K_pad, pool_w*fpo_cout_pad) plus per-column scale/shift rows.
    Conv F zero-padding, the ceil-mode F tail and all lane padding are folded into zero
    weight columns/rows, so the kernel needs no (f, c) bookkeeping."""
    Cout, _, KH, KW = w.shape
    wcols = pool_w * fpo_cout_pad
    M = np.zeros((KH * K_pad, wcols), np.float32)
    scale_cols = np.ones((wcols,), np.float32)
    shift_cols = np.zeros((wcols,), np.float32)
    wt = np.transpose(np.asarray(w, np.float32), (2, 3, 1, 0))       # (KH, KW, Cin, Cout)
    scale = np.asarray(scale, np.float32)
    shift = np.asarray(shift, np.float32)
    w_eff = wt * scale[None, None, None, :] if fold_scale else wt
    for j in range(pool_w):                                          # within-pool-window offset
        for fp in range(F_po):                                       # pooled F index
            f = fp * pool_w + j                                      # conv-output F index
            if f >= F_out:
                continue                                             # ceil-mode F tail: zero column
            c0 = j * fpo_cout_pad + fp * Cout
            scale_cols[c0:c0 + Cout] = scale
            shift_cols[c0:c0 + Cout] = shift
            for kw in range(KW):
                f_in = f * stride_f + kw - pad_f                     # unpadded input F index
                if f_in < 0 or f_in >= F:
                    continue                                         # conv F zero-padding folded in
                for kh in range(KH):
                    r0 = kh * K_pad + f_in * Cin
                    M[r0:r0 + Cin, c0:c0 + Cout] += w_eff[kh, kw]
    return M, scale_cols, shift_cols


def conv1l_block_forward(x_nchw, xlens, params, kernel_size, stride, pooling,
                         batch_norm=True, eps=1e-5, dropout=0.0,
                         compute_dtype=jnp.bfloat16, out_dtype=jnp.float32,
                         pool_rows_per_tile=None, k_pad_multiple=128,
                         vmem_limit_bytes=None):
    B, Cin, T, F = map(int, x_nchw.shape)
    KH, KW = int(kernel_size[0]), int(kernel_size[1])
    st, sf = int(stride[0]), int(stride[1])
    pad_t = pad_f = 1

    w = np.asarray(params["conv_w"], np.float32)                     # (Cout, Cin, KH, KW)
    b = np.asarray(params["conv_b"], np.float32)
    Cout = int(w.shape[0])

    # Fold conv bias + eval-mode BatchNorm into per-channel scale / shift.
    if batch_norm:
        gamma = np.asarray(params["bn_gamma"], np.float32)
        beta = np.asarray(params["bn_beta"], np.float32)
        mean = np.asarray(params["bn_mean"], np.float32)
        var = np.asarray(params["bn_var"], np.float32)
        scale = gamma / np.sqrt(var + eps)
        shift = beta + (b - mean) * scale
    else:
        scale = np.ones((Cout,), np.float32)
        shift = b

    T_out = (T + 2 * pad_t - KH) // st + 1
    F_out = (F + 2 * pad_f - KW) // sf + 1
    if len(pooling) > 0 and int(np.prod(pooling)) > 1:
        pool_k, pool_w, has_pool = int(pooling[0]), int(pooling[1]), True
    else:
        pool_k, pool_w, has_pool = 1, 1, False
    T_po = -(-T_out // pool_k)
    F_po = -(-F_out // pool_w)

    # Lane-dense padded widths: MXU-friendly contraction, unmasked output stores.
    K = F * Cin
    K_pad = _round_up(K, int(k_pad_multiple))
    fpo_cout_pad = _round_up(F_po * Cout, 128)
    wcols = pool_w * fpo_cout_pad

    in_item = jnp.dtype(compute_dtype).itemsize
    out_item = jnp.dtype(out_dtype).itemsize

    # ---- VMEM-capacity-aware T tile (in pooled rows) ----
    try:
        vmem_cap = int(pltpu.get_tpu_info().vmem_capacity_bytes)
    except Exception:
        vmem_cap = 64 << 20                       # conservative fallback (v7x per-TC VMEM)
    if pool_rows_per_tile is None:
        budget = int(vmem_cap * 0.45)             # leave headroom for compiler scratch etc.
        fixed = (KH * K_pad * wcols * in_item          # weight (single-buffered)
                 + 4 * wcols * 4                       # scale + shift rows
                 + 2 * max(KH - st, 0) * K_pad * in_item)   # per-tile input halo (x2 buffers)
        per_row = (2 * pool_k * st * K_pad * in_item   # input window, double-buffered
                   + pool_k * KH * K_pad * in_item     # im2col lane-concat slab
                   + 3 * pool_k * wcols * 4            # f32 matmul result + epilogue temps
                   + 2 * fpo_cout_pad * out_item)      # output, double-buffered
        tTp = max(8, ((budget - fixed) // max(per_row, 1)) // 8 * 8)
        tTp = min(tTp, 4096)
    else:
        tTp = max(1, int(pool_rows_per_tile))
    if tTp >= T_po:
        tTp = T_po                                 # single tile covers the utterance
    elif tTp >= 8:
        tTp = (tTp // 8) * 8                       # keep conv rows sublane-aligned when tiling
    n_t = -(-T_po // tTp)

    conv_rows = tTp * pool_k                       # conv-output rows per grid step
    row_step = conv_rows * st
    rows_in = (conv_rows - 1) * st + KH            # input rows (with halo) per grid step
    T_out_pad = n_t * conv_rows
    T_po_pad = n_t * tTp
    T_in = (T_out_pad - 1) * st + KH               # padded input rows per batch element

    # ---- pack input: NCHW -> (B*n_t, rows_in, K_pad); only the per-tile halo is duplicated ----
    x = jnp.transpose(x_nchw, (0, 2, 3, 1)).astype(compute_dtype).reshape(B, T, K)
    back = max(0, T_in - pad_t - T)
    x = jnp.pad(x, ((0, 0), (pad_t, back), (0, K_pad - K)))[:, :T_in]
    if n_t == 1:
        x_tiles = x.reshape(B, rows_in, K_pad)
    else:
        x_tiles = jnp.stack(
            [x[:, ti * row_step: ti * row_step + rows_in] for ti in range(n_t)],
            axis=1).reshape(B * n_t, rows_in, K_pad)

    # For bf16 compute keep BN scale as a separate f32 epilogue multiply (precision); for f32
    # compute fold it into the weights (one less VALU pass).
    fold_scale = (jnp.dtype(compute_dtype) == jnp.dtype(jnp.float32)) or (not batch_norm)
    M, scale_cols, shift_cols = _build_weights(
        w, scale, shift, stride_f=sf, pad_f=pad_f, F=F, F_out=F_out, F_po=F_po,
        pool_w=pool_w, Cin=Cin, K_pad=K_pad, fpo_cout_pad=fpo_cout_pad,
        fold_scale=fold_scale)
    w_mat = jnp.asarray(M).astype(compute_dtype)                      # (KH*K_pad, wcols)
    scale_row = jnp.asarray(scale_cols, jnp.float32).reshape(1, wcols)
    shift_row = jnp.asarray(shift_cols, jnp.float32).reshape(1, wcols)

    kernel = functools.partial(
        _conv_bn_relu_pool_kernel,
        kh_size=KH, stride_t=st, conv_rows=conv_rows, pool_k=pool_k, pool_w=pool_w,
        fpo_cout_pad=fpo_cout_pad, t_out_valid=T_out, n_t=n_t,
        apply_scale=(not fold_scale), needs_row_mask=(T_out_pad > T_out))

    n_tiles = B * n_t
    cost = pl.CostEstimate(
        flops=int(2 * n_tiles * conv_rows * (KH * K_pad) * wcols),
        transcendentals=0,
        bytes_accessed=int(n_tiles * rows_in * K_pad * in_item
                           + KH * K_pad * wcols * in_item
                           + n_tiles * tTp * fpo_cout_pad * out_item))

    if vmem_limit_bytes is None:
        vmem_limit_bytes = int(vmem_cap * 0.8)

    y = pl.pallas_call(
        kernel,
        out_shape=jax.ShapeDtypeStruct((n_tiles, tTp, fpo_cout_pad), out_dtype),
        grid=(n_tiles,),                           # flat parallel grid: megacore-friendly at B=1
        in_specs=[
            pl.BlockSpec((None, rows_in, K_pad), lambda p: (p, 0, 0)),   # per-tile halo'd window
            _const_block_spec((KH * K_pad, wcols), lambda p: (0, 0)),    # weight (single buffer)
            _const_block_spec((1, wcols), lambda p: (0, 0)),             # scale row
            _const_block_spec((1, wcols), lambda p: (0, 0)),             # shift row
        ],
        out_specs=pl.BlockSpec((None, tTp, fpo_cout_pad), lambda p: (p, 0, 0)),
        compiler_params=pltpu.CompilerParams(
            dimension_semantics=("parallel",),
            vmem_limit_bytes=vmem_limit_bytes),
        cost_estimate=cost,
    )(x_tiles, w_mat, scale_row, shift_row)

    # xlens updates (conv: floor; pool: ceil_mode=True, padding 0, stride == kernel).
    xlens = [int(np.floor((L + 2 * pad_t - KH) / st + 1)) for L in xlens]
    if has_pool:
        xlens = [int(np.ceil((L - pool_k) / pool_k + 1)) for L in xlens]

    y = y.reshape(B, T_po_pad, fpo_cout_pad)[:, :T_po, :F_po * Cout]
    y = y.reshape(B, T_po, F_po, Cout)
    return jnp.transpose(y, (0, 3, 1, 2)), xlens                       # NCHW, like PyTorch


def reference_forward(x_nchw, params, kernel_size, stride, pooling, batch_norm, eps=1e-5):
    """Pure-JAX (XLA) reference of the same eval-mode forward pass."""
    w, b = params["conv_w"], params["conv_b"]
    y = jax.lax.conv_general_dilated(
        x_nchw.astype(jnp.float32), w.astype(jnp.float32),
        window_strides=stride, padding=[(1, 1), (1, 1)],
        dimension_numbers=("NCHW", "OIHW", "NCHW"))
    y = y + b[None, :, None, None]
    if batch_norm:
        g, be = params["bn_gamma"], params["bn_beta"]
        m, v = params["bn_mean"], params["bn_var"]
        y = (y - m[None, :, None, None]) / jnp.sqrt(v[None, :, None, None] + eps)
        y = y * g[None, :, None, None] + be[None, :, None, None]
    y = jnp.maximum(y, 0.0)
    if len(pooling) > 0 and int(np.prod(pooling)) > 1:
        pk, pw = pooling
        T_out, F_out = y.shape[2], y.shape[3]
        pad_t = int(np.ceil(T_out / pk)) * pk - T_out
        pad_f = int(np.ceil(F_out / pw)) * pw - F_out
        y = jax.lax.reduce_window(
            y, -jnp.inf, jax.lax.max,
            window_dimensions=(1, 1, pk, pw), window_strides=(1, 1, pk, pw),
            padding=[(0, 0), (0, 0), (0, pad_t), (0, pad_f)])
    return y


if __name__ == "__main__":
    key = jax.random.PRNGKey(0)

    def make_params(k, Cin, Cout, kernel_size):
        k0, k1, k2, k3, k4, k5 = jax.random.split(k, 6)
        return {
            "conv_w": 0.1 * jax.random.normal(k0, (Cout, Cin, *kernel_size), jnp.float32),
            "conv_b": 0.1 * jax.random.normal(k1, (Cout,), jnp.float32),
            "bn_gamma": 1.0 + 0.1 * jax.random.normal(k2, (Cout,), jnp.float32),
            "bn_beta": 0.1 * jax.random.normal(k3, (Cout,), jnp.float32),
            "bn_mean": 0.1 * jax.random.normal(k4, (Cout,), jnp.float32),
            "bn_var": jnp.abs(1.0 + 0.1 * jax.random.normal(k5, (Cout,), jnp.float32)),
        }

    kernel_size, stride = (3, 3), (1, 1)
    configs = [
        # base case
        dict(B=2, Cin=4, T=8, F=16, Cout=8, pooling=(2, 2), bn=True, tile=None,
             dtype=jnp.float32, out=jnp.float32, tol=1e-4),
        # ceil-mode tails in both T and F (+ last-tile row masking, n_t == 1)
        dict(B=1, Cin=3, T=11, F=13, Cout=16, pooling=(2, 2), bn=True, tile=None,
             dtype=jnp.float32, out=jnp.float32, tol=1e-4),
        # multi-tile T grid: per-tile halo'd windows, last-tile-only masking, padded pooled rows
        dict(B=2, Cin=4, T=40, F=16, Cout=8, pooling=(2, 2), bn=True, tile=8,
             dtype=jnp.float32, out=jnp.float32, tol=1e-4),
        # no pooling / no batch-norm path
        dict(B=1, Cin=4, T=8, F=16, Cout=8, pooling=(), bn=False, tile=None,
             dtype=jnp.float32, out=jnp.float32, tol=1e-4),
        # bf16 compute + bf16 output (halved DMA bytes), f32 accumulation, f32 epilogue BN scale
        dict(B=2, Cin=4, T=8, F=16, Cout=8, pooling=(2, 2), bn=True, tile=None,
             dtype=jnp.bfloat16, out=jnp.bfloat16, tol=7.5e-2),
    ]

    for i, cfg in enumerate(configs):
        key, kp, kx = jax.random.split(key, 3)
        params = make_params(kp, cfg["Cin"], cfg["Cout"], kernel_size)
        x = jax.random.normal(kx, (cfg["B"], cfg["Cin"], cfg["T"], cfg["F"]), jnp.float32)
        xlens = [cfg["T"] - j for j in range(cfg["B"])]

        y, ylens = conv1l_block_forward(
            x, xlens, params, kernel_size, stride, cfg["pooling"], cfg["bn"],
            compute_dtype=cfg["dtype"], out_dtype=cfg["out"],
            pool_rows_per_tile=cfg["tile"])
        y = jax.block_until_ready(y)

        y_ref = reference_forward(x, params, kernel_size, stride, cfg["pooling"], cfg["bn"])
        assert y.shape == y_ref.shape, (i, y.shape, y_ref.shape)
        y_np = np.asarray(y, np.float32)
        err = float(np.max(np.abs(y_np - np.asarray(y_ref))))
        assert np.allclose(y_np, np.asarray(y_ref),
                           atol=cfg["tol"], rtol=cfg["tol"]), (i, err)

    print("KERNEL_OK")
</pallas_src>

<mosaic_0001>
module attributes {stable_mosaic.version = 11 : i64} {
  func.func @_conv_bn_relu_pool_kernel(%arg0: i32, %arg1: memref<1x10x128xf32, #tpu.memory_space<vmem>>, %arg2: memref<384x256xf32, #tpu.memory_space<vmem>>, %arg3: memref<1x256xf32, #tpu.memory_space<vmem>>, %arg4: memref<1x256xf32, #tpu.memory_space<vmem>>, %arg5: memref<1x4x128xf32, #tpu.memory_space<vmem>>) attributes {dimension_semantics = [#tpu.dimension_semantics<parallel>], iteration_bounds = array<i64: 2>, scalar_prefetch = 0 : i64, scratch_operands = 0 : i64, tpu.core_type = #tpu.core_type<tc>, window_params = [{transform_indices = @transform_0, window_bounds = array<i64: 1, 10, 128>}, {pipeline_mode = #tpu.pipeline_mode<synchronous>, transform_indices = @transform_1, window_bounds = array<i64: 384, 256>}, {pipeline_mode = #tpu.pipeline_mode<synchronous>, transform_indices = @transform_2, window_bounds = array<i64: 1, 256>}, {pipeline_mode = #tpu.pipeline_mode<synchronous>, transform_indices = @transform_3, window_bounds = array<i64: 1, 256>}, {transform_indices = @transform_4, window_bounds = array<i64: 1, 4, 128>}]} {
    %c0 = arith.constant 0 : index
    %c0_0 = arith.constant 0 : index
    %c0_1 = arith.constant 0 : index
    %0 = vector.load %arg1[%c0, %c0_0, %c0_1] : memref<1x10x128xf32, #tpu.memory_space<vmem>>, vector<1x8x128xf32>
    %1 = vector.shape_cast %0 : vector<1x8x128xf32> to vector<8x128xf32>
    %c0_2 = arith.constant 0 : index
    %c1 = arith.constant 1 : index
    %c0_3 = arith.constant 0 : index
    %2 = vector.load %arg1[%c0_2, %c1, %c0_3] : memref<1x10x128xf32, #tpu.memory_space<vmem>>, vector<1x8x128xf32>
    %3 = vector.shape_cast %2 : vector<1x8x128xf32> to vector<8x128xf32>
    %c0_4 = arith.constant 0 : index
    %c2 = arith.constant 2 : index
    %c0_5 = arith.constant 0 : index
    %4 = vector.load %arg1[%c0_4, %c2, %c0_5] : memref<1x10x128xf32, #tpu.memory_space<vmem>>, vector<1x8x128xf32>
    %5 = vector.shape_cast %4 : vector<1x8x128xf32> to vector<8x128xf32>
    %6 = tpu.concatenate %1, %3, %5 in 1 : vector<8x128xf32>, vector<8x128xf32>, vector<8x128xf32> -> vector<8x384xf32>
    %c0_6 = arith.constant 0 : index
    %c0_7 = arith.constant 0 : index
    %7 = vector.load %arg2[%c0_6, %c0_7] : memref<384x256xf32, #tpu.memory_space<vmem>>, vector<384x256xf32>
    %cst = arith.constant dense<0.000000e+00> : vector<8x256xf32>
    %8 = tpu.matmul %6, %7, %cst {dimension_numbers = #tpu.dot_dimension_numbers<[1], [0], [0], [1], [0, 0, 1, 1], [], []>} : vector<8x384xf32>, vector<384x256xf32>, vector<8x256xf32> -> vector<8x256xf32>
    %c0_8 = arith.constant 0 : index
    %c0_9 = arith.constant 0 : index
    %9 = vector.load %arg4[%c0_8, %c0_9] : memref<1x256xf32, #tpu.memory_space<vmem>>, vector<1x256xf32>
    %10 = vector.broadcast %9 : vector<1x256xf32> to vector<8x256xf32>
    %11 = arith.addf %8, %10 : vector<8x256xf32>
    %cst_10 = arith.constant 0.000000e+00 : f32
    %12 = vector.broadcast %cst_10 : f32 to vector<8x256xf32>
    %13 = arith.maximumf %11, %12 : vector<8x256xf32>
    %14 = vector.shape_cast %13 : vector<8x256xf32> to vector<4x2x256xf32>
    %cst_11 = arith.constant dense<0xFF800000> : vector<4x256xf32>
    %15 = vector.multi_reduction <maximumf>, %14, %cst_11 [1] : vector<4x2x256xf32> to vector<4x256xf32>
    %16 = vector.extract_strided_slice %15 {offsets = [0, 0], sizes = [4, 128], strides = [1, 1]} : vector<4x256xf32> to vector<4x128xf32>
    %17 = vector.extract_strided_slice %15 {offsets = [0, 128], sizes = [4, 128], strides = [1, 1]} : vector<4x256xf32> to vector<4x128xf32>
    %18 = arith.maximumf %16, %17 : vector<4x128xf32>
    %c0_12 = arith.constant 0 : index
    %c0_13 = arith.constant 0 : index
    %c0_14 = arith.constant 0 : index
    %19 = vector.load %arg5[%c0_12, %c0_13, %c0_14] : memref<1x4x128xf32, #tpu.memory_space<vmem>>, vector<1x4x128xf32>
    %20 = vector.shape_cast %19 : vector<1x4x128xf32> to vector<4x128xf32>
    %21 = vector.shape_cast %18 : vector<4x128xf32> to vector<1x4x128xf32>
    tpu.vector_store %arg5[%c0_12, %c0_13, %c0_14], %21 {strides = array<i32>} : memref<1x4x128xf32, #tpu.memory_space<vmem>>, vector<1x4x128xf32>,
    return
  }
  func.func @transform_0(%arg0: i32) -> (i32, i32, i32) {
    %c0_i32 = arith.constant 0 : i32
    %c0_i32_0 = arith.constant 0 : i32
    %c0_i32_1 = arith.constant 0 : i32
    return %arg0, %c0_i32, %c0_i32_0 : i32, i32, i32
  }
  func.func @transform_1(%arg0: i32) -> (i32, i32) {
    %c0_i32 = arith.constant 0 : i32
    %c0_i32_0 = arith.constant 0 : i32
    %c0_i32_1 = arith.constant 0 : i32
    return %c0_i32, %c0_i32_0 : i32, i32
  }
  func.func @transform_2(%arg0: i32) -> (i32, i32) {
    %c0_i32 = arith.constant 0 : i32
    %c0_i32_0 = arith.constant 0 : i32
    %c0_i32_1 = arith.constant 0 : i32
    return %c0_i32, %c0_i32_0 : i32, i32
  }
  func.func @transform_3(%arg0: i32) -> (i32, i32) {
    %c0_i32 = arith.constant 0 : i32
    %c0_i32_0 = arith.constant 0 : i32
    %c0_i32_1 = arith.constant 0 : i32
    return %c0_i32, %c0_i32_0 : i32, i32
  }
  func.func @transform_4(%arg0: i32) -> (i32, i32, i32) {
    %c0_i32 = arith.constant 0 : i32
    %c0_i32_0 = arith.constant 0 : i32
    %c0_i32_1 = arith.constant 0 : i32
    return %arg0, %c0_i32, %c0_i32_0 : i32, i32, i32
  }
}

</mosaic_0001>

<bundles_post_ra>
// kernel: tpu_custom_call.1
= control target key start
LH: loop header
LB: loop body
LE: loop exit
PB: predicated region body
PF: predicated region fallthrough
CT: control target
= control target key end

     0   :  { %9 = vsyncpa [#allocation3], 0  ;;  %s1139_s0 = inlined_call_operand.vmem [shape: f32[2,10,128], index: 0, kind: input, shape index: {}]   ;;  %s1140_s1 = inlined_call_operand.hbm [shape: f32[384,256], index: 1, kind: input, shape index: {}]   ;;  %s1141_s2 = inlined_call_operand.vmem [shape: f32[1,256], index: 2, kind: input, shape index: {}]   ;;  %s1142_s3 = inlined_call_operand.vmem [shape: f32[1,256], index: 3, kind: input, shape index: {}]   ;;  %s1143_s4 = inlined_call_operand.hbm [shape: f32[2,4,128], index: 4, kind: output, shape index: {}]  }
   0x1   :  { %10 = vsyncpa [#allocation4], 0 }
   0x2   :  { %12 = vsyncpa [#allocation4 + $0x1], 0  ;;  %s979_s15 = smov 0   ;;  %s981_s16 = smov 0  }
   0x3   :  { %s983_s17 = smov 0   ;;  %s985_s18 = smov 0  }
   0x4 LB: > { %s1000_s2 = sadd.s32 4294967295, %s946_s18   ;;  %s684_s19 = sadd.s32 4294967294, %s946_s18   ;;  %s946_s18 = sphi %s985_s18, %s1159_s18   ;;  %s942_s17 = sphi %s983_s17, %s1158_s17   ;;  %s938_s16 = sphi %s981_s16, %s1157_s16   ;;  %s934_s15 = sphi %s979_s15, %s1156_s15  }
   0x5   : > { %s1004_s20 = sadd.s32 1, %s946_s18   ;;  %s114_s21 = sadd.s32 1, %s942_s17 }
   0x6   : > { %s111_s22 = ssub.s32 %s946_s18, %s1004_s20  ;;  %p124_p0 = scmp.ne.s32.totalorder %s942_s17, %s938_s16 }
   0x7   : > { %p112_p1 = scmp.eq.s32.totalorder %s111_s22, 0  ;;  %p125_p2 = scmp.eq.s32.totalorder %s1000_s2, 1 }
   0x8   : > { %p130_p3 = scmp.ne.s32.totalorder %s938_s16, %s934_s15  ;;  %p131_p4 = scmp.eq.s32.totalorder %s684_s19, 1 }
   0x9   : > { %s1015_s23 = scalar_select %p112_p1, %s942_s17, %s114_s21  }
   0xa   : > { %p1017_p5 = por %p125_p2, %p124_p0  ;;  %p1021_p6 = por %p131_p4, %p130_p3 }
   0xb   : > { %p685_p7 = scmp.ge.s32.totalorder %s946_s18, 1  ;;  %p138_p8 = scmp.lt.s32.totalorder %s946_s18, 3 }
   0xc   : > { %s1147_s24 = scalar_select %p1017_p5, 1, 0 }
   0xd   : > { %s1148_s25 = scalar_select %p1021_p6, 1, 0 }
   0xe   : > { %p1144_p9 = scmp.eq.s32.totalorder %s1000_s2, 0  ;;  %p1028_p10 = pnand %p685_p7, %p138_p8 }
   0xf   : > { %s948_s27 = smov [#allocation2]   ;;  %s852_s6 = scalar_lea.hbm %s1140_s1, 12288 }
  0x10   : > { %s1149_s26 = scalar_select %p1028_p10, 1, 0 }
  0x11   : > { %s150_s28 = sshll.u32 %s948_s27, 4  ;;  %p804_p11 = pneg %p1028_p10  ;;  %s151_s28 = int_to_ptr.vmem [resolvable:$true] %s150_s28 }
  0x12   : > { %p853_p13 = scmp.ne.s32.totalorder %s1140_s1, %s852_s6  ;;  %p859_p3 = scmp.lt.u32.totalorder %s852_s6, %s1140_s1 }
  0x13   : > { %p1036_p12 = pnand %p1144_p9, %p804_p11 }
  0x15   : > { %p854_p0 = pneg %p1036_p12 }
  0x17   : > { %p855_p1 = pnand %p854_p0, %p853_p13 }
  0x19   : > { %p856_p2 = pneg %p855_p1 }
  0x1b   : > { %p861_p4 = pnand %p859_p3, %p856_p2 }
  0x1d   : > { %864 = shalt.err (!%p861_p4)
}
  0x1e   : > { %s865_s11 = scalar_lea.vmem %s151_s28, 12288  ;;  %p873_p9 = scmp.lt.s32.totalorder %s151_s28, %s151_s28 }
  0x1f   : > { %p866_p7 = scmp.ne.s32.totalorder %s151_s28, %s865_s11  ;;  %p874_p6 = scmp.lt.s32.totalorder %s865_s11, %s865_s11 }
  0x21   : > { %p868_p8 = pnand %p866_p7, %p854_p0  ;;  %p875_p5 = por %p874_p6, %p873_p9 }
  0x23   : > { %p869_p11 = pneg %p868_p8 }
  0x25   : > { %p876_p10 = pnand %p875_p5, %p869_p11 }
  0x27   : > { %879 = shalt.err (!%p876_p10)
}
  0x28   : > { %s949_s12 = smov 256   ;;  %s950_s13 = smov 16  }
  0x29   : > { %807 = dma.hbm_to_vmem [thread:$0]  (!%p1036_p12), %s1140_s1, 12288, %s151_s28, [#allocation3], %s949_s12, %s949_s12, %s950_s13  }
  0x2a   : > { %p1151_p13 = scmp.ne.s32.totalorder %s1149_s26, 0 }
  0x2b   : > { %p1152_p1 = scmp.eq.s32.totalorder (!%p1151_p13), %s1000_s2, 0 }
  0x2c   : > { %180 = sbr.rel (%p1151_p13) target bundleno = 382 (0x17e), region = 36 }
  0x33   : > { %925 = dma.done.wait (%p1152_p1), [#allocation3], 12288   ;;  %p1153_p0 = pmov %p1152_p1 }
  0x34   : > { %v951_v0 = vmov 0.0   ;;  %v215_v1 = vld [vmem:[#allocation2 + $0x8] sm:$0xff]  ;;  %v217_v2 = vld [vmem:[#allocation2 + $0x18] sm:$0xff]  ;;  %v214_v3 = vld [vmem:[#allocation2] sm:$0xff]  ;;  %p206_p5 = scmp.lt.s32.totalorder %s1000_s2, 1  ;;  %vm526_vm0 = vcmask 1041408  }
  0x35   : > { %927 = vsyncadd (%p1153_p0), [#allocation3], 4294955008  ;;  %457 = vmatprep.mubr.f32.mxu0 %v951_v0  ;;  %v698_v4 = vpack.c.bf16 %v217_v2, %v215_v1  ;;  %v216_v5 = vld [vmem:[#allocation2 + $0x10] sm:$0xff]  ;;  %v219_v6 = vld [vmem:[#allocation2 + $0x28] sm:$0xff]  ;;  %s203_s5 = sand.u32 1, %s938_s16   ;;  %vm591_vm1 = vcmask 1041409  }
  0x36   : > { %v221_v7 = vld [vmem:[#allocation2 + $0x38] sm:$0xff]  ;;  %v700_v8 = vpack.c.bf16 %v216_v5, %v214_v3  ;;  %v218_v10 = vld [vmem:[#allocation2 + $0x20] sm:$0xff]  ;;  %v220_v11 = vld [vmem:[#allocation2 + $0x30] sm:$0xff]  ;;  %s1066_s21 = scalar_select %p206_p5, %s1000_s2, 1  ;;  %vm593_vm2 = vcmask 1042434   ;;  %vm595_vm3 = vcmask 1043459  }
  0x37   : > { %v702_v9 = vpack.c.bf16 %v221_v7, %v219_v6  ;;  %v223_v12 = vld [vmem:[#allocation2 + $0x48] sm:$0xff]  ;;  %699 = vmatprep.subr.bf16.mxu1 %v698_v4  ;;  %v225_v13 = vld [vmem:[#allocation2 + $0x58] sm:$0xff]  ;;  %v704_v14 = vpack.c.bf16 %v220_v11, %v218_v10  ;;  %v222_v16 = vld [vmem:[#allocation2 + $0x40] sm:$0xff]  ;;  %s690_s6 = sshll.u32 %s203_s5, 2  ;;  %s694_s7 = sshll.u32 %s1000_s2, 6 }
  0x38   : > { %701 = vmatpush1.bf16.msra.mxu1 %v700_v8  ;;  %v706_v15 = vpack.c.bf16 %v225_v13, %v223_v12  ;;  %v224_v17 = vld [vmem:[#allocation2 + $0x50] sm:$0xff]  ;;  %v227_v18 = vld [vmem:[#allocation2 + $0x68] sm:$0xff]  ;;  %v229_v19 = vld [vmem:[#allocation2 + $0x78] sm:$0xff]  ;;  %s697_s22 = sshll.u32 %s1066_s21, 4  ;;  %s205_s8 = scalar_lea.vmem [#allocation5], %s690_s6 }
  0x39   : > { %703 = vmatprep.subr.bf16.mxu1 %v702_v9  ;;  %v708_v20 = vpack.c.bf16 %v224_v17, %v222_v16  ;;  %v710_v21 = vpack.c.bf16 %v229_v19, %v227_v18  ;;  %v226_v22 = vld [vmem:[#allocation2 + $0x60] sm:$0xff]  ;;  %v228_v23 = vld [vmem:[#allocation2 + $0x70] sm:$0xff]  ;;  %v231_v24 = vld [vmem:[#allocation2 + $0x88] sm:$0xff]  ;;  %s1072_s28 = scalar_lea.vmem %s1139_s0, %s697_s22  ;;  %s613_s9 = sshll.u32 %s205_s8, 4  ;;  %s1097_s9 = int_to_ptr.vmem [resolvable:$true] %s613_s9 }
  0x3a   : > { %v233_v25 = vld [vmem:[#allocation2 + $0x98] sm:$0xff]  ;;  %v712_v26 = vpack.c.bf16 %v228_v23, %v226_v22  ;;  %v279_v27 = vld [vmem:[#allocation2 + $0x208] sm:$0xff]  ;;  %v278_v29 = vld [vmem:[#allocation2 + $0x200] sm:$0xff]  ;;  %s1095_s12 = scalar_lea.hbm %s1143_s4, %s694_s7  ;;  %s600_s13 = scalar_lea.sflag [#allocation4], %s203_s5 }
  0x3b   : > { %v281_v28 = vld [vmem:[#allocation2 + $0x218] sm:$0xff]  ;;  %v714_v30 = vpack.c.bf16 %v233_v25, %v231_v24  ;;  %v230_v31 = vld [vmem:[#allocation2 + $0x80] sm:$0xff]  ;;  %v232_v32 = vld [vmem:[#allocation2 + $0x90] sm:$0xff]  ;;  %s880_s2 = scalar_lea.vmem %s1097_s9, 64  ;;  %p1154_p9 = scmp.ne.s32.totalorder %s1147_s24, 0 }
  0x3c   : > { %705 = vmatpush1.bf16.msra.mxu1 %v704_v14  ;;  %v762_v33 = vpack.c.bf16 %v281_v28, %v279_v27  ;;  %v280_v34 = vld [vmem:[#allocation2 + $0x210] sm:$0xff]  ;;  %v235_v35 = vld [vmem:[#allocation2 + $0xa8] sm:$0xff]  ;;  %v237_v36 = vld [vmem:[#allocation2 + $0xb8] sm:$0xff]  ;;  %v716_v42 = vpack.c.bf16 %v232_v32, %v230_v31  ;;  %p881_p6 = scmp.ne.s32.totalorder %s1097_s9, %s880_s2  ;;  %s953_s14 = smov [#allocation5]  }
  0x3d   : > { %707 = vmatprep.subr.bf16.mxu1 %v706_v15  ;;  %v764_v37 = vpack.c.bf16 %v280_v34, %v278_v29  ;;  %v283_v38 = vld [vmem:[#allocation2 + $0x228] sm:$0xff]  ;;  %v285_v39 = vld [vmem:[#allocation2 + $0x238] sm:$0xff]  ;;  %v282_v40 = vld [vmem:[#allocation2 + $0x220] sm:$0xff]  ;;  %v718_v47 = vpack.c.bf16 %v237_v36, %v235_v35  ;;  %s884_s19 = sshll.u32 %s953_s14, 4  ;;  %s885_s19 = int_to_ptr.vmem [resolvable:$false] %s884_s19 }
  0x3e   : > { %763 = vmatprep.subr.bf16.mxu0 %v762_v33  ;;  %v284_v41 = vld [vmem:[#allocation2 + $0x230] sm:$0xff]  ;;  %v234_v43 = vld [vmem:[#allocation2 + $0xa0] sm:$0xff]  ;;  %v766_v45 = vpack.c.bf16 %v285_v39, %v283_v38  ;;  %v239_v48 = vld [vmem:[#allocation2 + $0xc8] sm:$0xff]  ;;  %p882_p10 = pnand %p881_p6, %p1154_p9  ;;  %s886_s21 = scalar_lea.vmem %s885_s19, 128 }
  0x3f   : > { %v236_v44 = vld [vmem:[#allocation2 + $0xb0] sm:$0xff]  ;;  %765 = vmatpush1.bf16.msra.mxu0 %v764_v37  ;;  %v768_v46 = vpack.c.bf16 %v284_v41, %v282_v40  ;;  %v287_v49 = vld [vmem:[#allocation2 + $0x248] sm:$0xff]  ;;  %v289_v50 = vld [vmem:[#allocation2 + $0x258] sm:$0xff]  ;;  %p887_p2 = scmp.lt.s32.totalorder %s1097_s9, %s885_s19  ;;  %p888_p3 = scmp.lt.s32.totalorder %s886_s21, %s880_s2 }
  0x40   : > { %709 = vmatpush1.bf16.msra.mxu1 %v708_v20  ;;  %v241_v51 = vld [vmem:[#allocation2 + $0xd8] sm:$0xff]  ;;  %767 = vmatprep.subr.bf16.mxu0 %v766_v45  ;;  %v770_v52 = vpack.c.bf16 %v289_v50, %v287_v49  ;;  %v286_v53 = vld [vmem:[#allocation2 + $0x240] sm:$0xff]  ;;  %v288_v54 = vld [vmem:[#allocation2 + $0x250] sm:$0xff]  ;;  %v720_v55 = vpack.c.bf16 %v236_v44, %v234_v43  ;;  %p883_p12 = pneg %p882_p10 }
  0x41   : > { %711 = vmatprep.subr.bf16.mxu1 %v710_v21  ;;  %v238_v56 = vld [vmem:[#allocation2 + $0xc0] sm:$0xff]  ;;  %v772_v57 = vpack.c.bf16 %v288_v54, %v286_v53  ;;  %v291_v58 = vld [vmem:[#allocation2 + $0x268] sm:$0xff]  ;;  %v293_v59 = vld [vmem:[#allocation2 + $0x278] sm:$0xff]  ;;  %v722_v60 = vpack.c.bf16 %v241_v51, %v239_v48  ;;  %p889_p4 = por %p888_p3, %p887_p2 }
  0x42   : > { %v240_v61 = vld [vmem:[#allocation2 + $0xd0] sm:$0xff]  ;;  %v774_v62 = vpack.c.bf16 %v293_v59, %v291_v58  ;;  %v290_v63 = vld [vmem:[#allocation2 + $0x260] sm:$0xff]  ;;  %v243_v1 = vld [vmem:[#allocation2 + $0xe8] sm:$0xff] }
  0x43   : > { %769 = vmatpush1.bf16.msra.mxu0 %v768_v46  ;;  %v292_v0 = vld [vmem:[#allocation2 + $0x270] sm:$0xff]  ;;  %v245_v2 = vld [vmem:[#allocation2 + $0xf8] sm:$0xff]  ;;  %v295_v3 = vld [vmem:[#allocation2 + $0x288] sm:$0xff]  ;;  %v724_v5 = vpack.c.bf16 %v240_v61, %v238_v56  ;;  %p890_p7 = pnand %p889_p4, %p883_p12 }
  0x44   : > { %713 = vmatpush1.bf16.msra.mxu1 %v712_v26  ;;  %771 = vmatprep.subr.bf16.mxu0 %v770_v52  ;;  %v297_v4 = vld [vmem:[#allocation2 + $0x298] sm:$0xff]  ;;  %v242_v6 = vld [vmem:[#allocation2 + $0xe0] sm:$0xff]  ;;  %v244_v7 = vld [vmem:[#allocation2 + $0xf0] sm:$0xff]  ;;  %v776_v8 = vpack.c.bf16 %v292_v0, %v290_v63  ;;  %v726_v9 = vpack.c.bf16 %v245_v2, %v243_v1 }
  0x45   : > { %715 = vmatprep.subr.bf16.mxu1 %v714_v30  ;;  %v247_v10 = vld [vmem:[#allocation2 + $0x108] sm:$0xff]  ;;  %v778_v11 = vpack.c.bf16 %v297_v4, %v295_v3  ;;  %v294_v12 = vld [vmem:[#allocation2 + $0x280] sm:$0xff]  ;;  %v296_v13 = vld [vmem:[#allocation2 + $0x290] sm:$0xff]  ;;  %v728_v17 = vpack.c.bf16 %v244_v7, %v242_v6 }
  0x46   : > { %v249_v14 = vld [vmem:[#allocation2 + $0x118] sm:$0xff]  ;;  %v299_v15 = vld [vmem:[#allocation2 + $0x2a8] sm:$0xff]  ;;  %v246_v18 = vld [vmem:[#allocation2 + $0x100] sm:$0xff]  ;;  %v780_v20 = vpack.c.bf16 %v296_v13, %v294_v12 }
  0x47   : > { %773 = vmatpush1.bf16.msra.mxu0 %v772_v57  ;;  %v301_v16 = vld [vmem:[#allocation2 + $0x2b8] sm:$0xff]  ;;  %v248_v19 = vld [vmem:[#allocation2 + $0x110] sm:$0xff]  ;;  %v730_v21 = vpack.c.bf16 %v249_v14, %v247_v10  ;;  %v251_v22 = vld [vmem:[#allocation2 + $0x128] sm:$0xff] }
  0x48   : > { %717 = vmatpush1.bf16.msra.mxu1 %v716_v42  ;;  %775 = vmatprep.subr.bf16.mxu0 %v774_v62  ;;  %v782_v23 = vpack.c.bf16 %v301_v16, %v299_v15  ;;  %v298_v24 = vld [vmem:[#allocation2 + $0x2a0] sm:$0xff]  ;;  %v300_v25 = vld [vmem:[#allocation2 + $0x2b0] sm:$0xff]  ;;  %v253_v26 = vld [vmem:[#allocation2 + $0x138] sm:$0xff]  ;;  %v732_v29 = vpack.c.bf16 %v248_v19, %v246_v18 }
  0x49   : > { %719 = vmatprep.subr.bf16.mxu1 %v718_v47  ;;  %v303_v27 = vld [vmem:[#allocation2 + $0x2c8] sm:$0xff]  ;;  %v305_v28 = vld [vmem:[#allocation2 + $0x2d8] sm:$0xff]  ;;  %v250_v30 = vld [vmem:[#allocation2 + $0x120] sm:$0xff]  ;;  %v784_v32 = vpack.c.bf16 %v300_v25, %v298_v24  ;;  %v734_v34 = vpack.c.bf16 %v253_v26, %v251_v22  ;;  %v312_v22 = vlaneseq }
  0x4a   : > { %v252_v31 = vld [vmem:[#allocation2 + $0x130] sm:$0xff]  ;;  %v212_v33 = vld [vmem:[%s1072_s28 + $0x1] sm:$0xff]  ;;  %v786_v36 = vpack.c.bf16 %v305_v28, %v303_v27  ;;  %v257_v39 = vld [vmem:[#allocation2 + $0x158] sm:$0xff]  ;;  %v952_v28 = vmov 1983009808  }
  0x4b   : > { %777 = vmatpush1.bf16.msra.mxu0 %v776_v8  ;;  %v255_v35 = vld [vmem:[#allocation2 + $0x148] sm:$0xff]  ;;  %v302_v37 = vld [vmem:[#allocation2 + $0x2c0] sm:$0xff]  ;;  %v304_v38 = vld [vmem:[#allocation2 + $0x2d0] sm:$0xff]  ;;  %386 = vmatprep.mubr.f32.mxu1 %v212_v33  ;;  %v736_v42 = vpack.c.bf16 %v252_v31, %v250_v30 }
  0x4c   : > { %721 = vmatpush1.bf16.msra.mxu1 %v720_v55  ;;  %779 = vmatprep.subr.bf16.mxu0 %v778_v11  ;;  %v307_v40 = vld [vmem:[#allocation2 + $0x2e8] sm:$0xff]  ;;  %v309_v41 = vld [vmem:[#allocation2 + $0x2f8] sm:$0xff]  ;;  %v254_v43 = vld [vmem:[#allocation2 + $0x140] sm:$0xff]  ;;  %v788_v44 = vpack.c.bf16 %v304_v38, %v302_v37  ;;  %v738_v45 = vpack.c.bf16 %v257_v39, %v255_v35 }
  0x4d   : > { %723 = vmatprep.subr.bf16.mxu1 %v722_v60  ;;  %v256_v46 = vld [vmem:[#allocation2 + $0x150] sm:$0xff]  ;;  %v790_v47 = vpack.c.bf16 %v309_v41, %v307_v40  ;;  %v306_v48 = vld [vmem:[#allocation2 + $0x2e0] sm:$0xff]  ;;  %v259_v50 = vld [vmem:[#allocation2 + $0x168] sm:$0xff] }
  0x4e   : > { %v308_v49 = vld [vmem:[#allocation2 + $0x2f0] sm:$0xff]  ;;  %v261_v51 = vld [vmem:[#allocation2 + $0x178] sm:$0xff]  ;;  %v740_v52 = vpack.c.bf16 %v256_v46, %v254_v43  ;;  %v258_v55 = vld [vmem:[#allocation2 + $0x160] sm:$0xff] }
  0x4f   : > { %781 = vmatpush1.bf16.msra.mxu0 %v780_v20  ;;  %v792_v53 = vpack.c.bf16 %v308_v49, %v306_v48  ;;  %v742_v54 = vpack.c.bf16 %v261_v51, %v259_v50  ;;  %v260_v56 = vld [vmem:[#allocation2 + $0x170] sm:$0xff]  ;;  %v263_v57 = vld [vmem:[#allocation2 + $0x188] sm:$0xff]  ;;  %v265_v58 = vld [vmem:[#allocation2 + $0x198] sm:$0xff] }
  0x50   : > { %725 = vmatpush1.bf16.msra.mxu1 %v724_v5  ;;  %783 = vmatprep.subr.bf16.mxu0 %v782_v23  ;;  %v744_v59 = vpack.c.bf16 %v260_v56, %v258_v55  ;;  %v213_v60 = vld [vmem:[%s1072_s28 + $0x2] sm:$0xff]  ;;  %v746_v61 = vpack.c.bf16 %v265_v58, %v263_v57  ;;  %v264_v63 = vld [vmem:[#allocation2 + $0x190] sm:$0xff]  ;;  %v269_v1 = vld [vmem:[#allocation2 + $0x1b8] sm:$0xff]  ;;  %v313_v23 = vshrl.u32 %v312_v22, 7 }
  0x51   : > { %727 = vmatprep.subr.bf16.mxu1 %v726_v9  ;;  %v262_v62 = vld [vmem:[#allocation2 + $0x180] sm:$0xff]  ;;  %v267_v0 = vld [vmem:[#allocation2 + $0x1a8] sm:$0xff]  ;;  %v268_v5 = vld [vmem:[#allocation2 + $0x1b0] sm:$0xff] }
  0x52   : > { %v748_v2 = vpack.c.bf16 %v264_v63, %v262_v62  ;;  %v750_v3 = vpack.c.bf16 %v269_v1, %v267_v0  ;;  %v266_v4 = vld [vmem:[#allocation2 + $0x1a0] sm:$0xff]  ;;  %v271_v6 = vld [vmem:[#allocation2 + $0x1c8] sm:$0xff]  ;;  %v273_v7 = vld [vmem:[#allocation2 + $0x1d8] sm:$0xff]  ;;  %v314_v24 = vsub.s32 0, %v313_v23  ;;  %v318_v26 = vsub.s32 1, %v313_v23 }
  0x53   : > { %785 = vmatpush1.bf16.msra.mxu0 %v784_v32  ;;  %v752_v8 = vpack.c.bf16 %v268_v5, %v266_v4  ;;  %v754_v9 = vpack.c.bf16 %v273_v7, %v271_v6  ;;  %v270_v10 = vld [vmem:[#allocation2 + $0x1c0] sm:$0xff]  ;;  %v272_v11 = vld [vmem:[#allocation2 + $0x1d0] sm:$0xff]  ;;  %v275_v12 = vld [vmem:[#allocation2 + $0x1e8] sm:$0xff] }
  0x54   : > { %729 = vmatpush1.bf16.msra.mxu1 %v728_v17  ;;  %787 = vmatprep.subr.bf16.mxu0 %v786_v36  ;;  %v277_v13 = vld [vmem:[#allocation2 + $0x1f8] sm:$0xff]  ;;  %v756_v14 = vpack.c.bf16 %v272_v11, %v270_v10  ;;  %v274_v16 = vld [vmem:[#allocation2 + $0x1e0] sm:$0xff]  ;;  %v276_v17 = vld [vmem:[#allocation2 + $0x1f0] sm:$0xff] }
  0x55   : > { %731 = vmatprep.subr.bf16.mxu1 %v730_v21  ;;  %v758_v15 = vpack.c.bf16 %v277_v13, %v275_v12  ;;  %v760_v18 = vpack.c.bf16 %v276_v17, %v274_v16  ;;  %v211_v19 = vld [vmem:[%s1072_s28] sm:$0xff] }
  0x56   : > { %v310_v25 = vld [vmem:[%s1142_s3] sm:$0x3] }
  0x57   : > { %789 = vmatpush1.bf16.msra.mxu0 %v788_v44  ;;  %v315_v27 = vrot.slane %v310_v25, %v314_v24  ;;  %v319_v30 = vrot.slane %v310_v25, %v318_v26 }
  0x58   : > { %733 = vmatpush1.bf16.msra.mxu1 %v732_v29  ;;  %791 = vmatprep.subr.bf16.mxu0 %v790_v47  ;;  %v471_v29 = vunpack.c.l.s4 %v952_v28 }
  0x59   : > { %735 = vmatprep.subr.bf16.mxu1 %v734_v34 }
  0x5a   : > { %v472_v34 = vunpack.c.0.s8 %v471_v29 }
  0x5b   : > { %793 = vmatpush1.bf16.msra.mxu0 %v792_v53 }
  0x5c   : > { %737 = vmatpush1.bf16.msra.mxu1 %v736_v42  ;;  %v475_v39 = vsub.s32 %v472_v34, %v313_v23 }
  0x5d   : > { %739 = vmatprep.subr.bf16.mxu1 %v738_v45 }
  0x5e   : > { %458 = vmatmul.mubr.f32.vlgmr.msra.gmra.mrb[0].mxu0 %v213_v60 }
  0x60   : > { %741 = vmatpush1.bf16.msra.mxu1 %v740_v52 }
  0x61   : > { %743 = vmatprep.subr.bf16.mxu1 %v742_v54 }
  0x64   : > { %745 = vmatpush1.bf16.msra.mxu1 %v744_v59 }
  0x65   : > { %747 = vmatprep.subr.bf16.mxu1 %v746_v61 }
  0x68   : > { %749 = vmatpush1.bf16.msra.mxu1 %v748_v2 }
  0x69   : > { %751 = vmatprep.subr.bf16.mxu1 %v750_v3 }
  0x6c   : > { %753 = vmatpush1.bf16.msra.mxu1 %v752_v8 }
  0x6d   : > { %755 = vmatprep.subr.bf16.mxu1 %v754_v9 }
  0x70   : > { %757 = vmatpush1.bf16.msra.mxu1 %v756_v14 }
  0x71   : > { %759 = vmatprep.subr.bf16.mxu1 %v758_v15 }
  0x74   : > { %761 = vmatpush1.bf16.msra.mxu1 %v760_v18 }
  0x77   : > { %387 = vmatmul.mubr.f32.vlgmr.msra.gmra.mrb[0].mxu1 %v211_v19 }
 0x131   : > { %v459_v20 = vpop.f32.mrb[0].mxu0 }
 0x132   : > { %v461_v21 = vpop.f32.mrb[1].mxu0 }
 0x14a   : > { %v388_v31 = vpop.f32.mrb[0].mxu1 }
 0x14b   : > { %v389_v32 = vadd.f32 %v388_v31, %v315_v27  ;;  %v390_v33 = vpop.f32.mrb[1].mxu1 }
 0x14c   : > { %v391_v35 = vadd.f32 %v390_v33, %v319_v30 }
 0x14d   : > { %v460_v36 = vadd.f32 %v459_v20, %v389_v32 }
 0x14e   : > { %v462_v37 = vadd.f32 %v461_v21, %v391_v35 }
 0x14f   : > { %v464_v38 = vmax.f32 %v460_v36, 0.0 }
 0x150   : > { %v465_v40 = vmax.f32 %v462_v37, 0.0 }
 0x152   : > { %v468_v41 = vcombine.low %v464_v38, %v465_v40  ;;  %v469_v42 = vcombine.high %v464_v38, %v465_v40 }
 0x154   : > { %v476_v43 = vrot.slane %v468_v41, %v475_v39  ;;  %v483_v44 = vrot.slane %v469_v42, %v475_v39 }
 0x156   : > { %v484_v45 = vcombine.high %v476_v43, %v476_v43  ;;  %v485_v46 = vcombine.high %v483_v44, %v483_v44  ;;  %v492_v47 = vrot.slane %v476_v43, %v475_v39  ;;  %v508_v48 = vrot.slane %v483_v44, %v475_v39 }
 0x158   : > { %v493_v49 = vcombine.high %v492_v47, %v492_v47  ;;  %v500_v50 = vrot.slane %v484_v45, %v475_v39  ;;  %v509_v51 = vcombine.high %v508_v48, %v508_v48  ;;  %v516_v52 = vrot.slane %v485_v46, %v475_v39 }
 0x159   : > { %v527_v53 = vsel %vm526_vm0, %v492_v47, -inf  ;;  %v555_v54 = vsel %vm526_vm0, %v508_v48, -inf }
 0x15a   : > { %v501_v55 = vcombine.high %v500_v50, %v500_v50  ;;  %v517_v56 = vcombine.high %v516_v52, %v516_v52  ;;  %v528_v57 = vrot.slane %v527_v53, 4  ;;  %v534_v58 = vsel %vm526_vm0, %v493_v49, -inf }
 0x15b   : > { %v535_v59 = vrot.slane %v534_v58, 4  ;;  %v541_v60 = vsel %vm526_vm0, %v500_v50, -inf  ;;  %v556_v61 = vrot.slane %v555_v54, 4  ;;  %v562_v62 = vsel %vm526_vm0, %v509_v51, -inf }
 0x15c   : > { %v529_v63 = vmax.f32 %v527_v53, %v528_v57  ;;  %v542_v0 = vrot.slane %v541_v60, 4  ;;  %v548_v1 = vsel %vm526_vm0, %v501_v55, -inf  ;;  %v563_v2 = vrot.slane %v562_v62, 4 }
 0x15d   : > { %v536_v3 = vmax.f32 %v534_v58, %v535_v59  ;;  %v549_v4 = vrot.slane %v548_v1, 4  ;;  %v557_v5 = vmax.f32 %v555_v54, %v556_v61  ;;  %v569_v6 = vsel %vm526_vm0, %v516_v52, -inf }
 0x15e   : > { %v530_v7 = vrot.slane %v529_v63, 2  ;;  %v543_v8 = vmax.f32 %v541_v60, %v542_v0  ;;  %v564_v9 = vmax.f32 %v562_v62, %v563_v2  ;;  %v570_v10 = vrot.slane %v569_v6, 4 }
 0x15f   : > { %v537_v11 = vrot.slane %v536_v3, 2  ;;  %v550_v12 = vmax.f32 %v548_v1, %v549_v4  ;;  %v558_v13 = vrot.slane %v557_v5, 2  ;;  %v576_v14 = vsel %vm526_vm0, %v517_v56, -inf }
 0x160   : > { %v531_v15 = vmax.f32 %v529_v63, %v530_v7  ;;  %v544_v16 = vrot.slane %v543_v8, 2  ;;  %v565_v17 = vrot.slane %v564_v9, 2  ;;  %v571_v18 = vmax.f32 %v569_v6, %v570_v10 }
 0x161   : > { %v538_v19 = vmax.f32 %v536_v3, %v537_v11  ;;  %v551_v20 = vrot.slane %v550_v12, 2  ;;  %v559_v21 = vmax.f32 %v557_v5, %v558_v13  ;;  %v577_v22 = vrot.slane %v576_v14, 4 }
 0x162   : > { %v532_v23 = vrot.slane %v531_v15, 1  ;;  %v545_v24 = vmax.f32 %v543_v8, %v544_v16  ;;  %v566_v25 = vmax.f32 %v564_v9, %v565_v17  ;;  %v572_v26 = vrot.slane %v571_v18, 2 }
 0x163   : > { %v539_v27 = vrot.slane %v538_v19, 1  ;;  %v552_v28 = vmax.f32 %v550_v12, %v551_v20  ;;  %v578_v29 = vmax.f32 %v576_v14, %v577_v22  ;;  %v560_v31 = vrot.slane %v559_v21, 1 }
 0x164   : > { %v546_v30 = vrot.slane %v545_v24, 1  ;;  %v567_v32 = vrot.slane %v566_v25, 1  ;;  %v573_v33 = vmax.f32 %v571_v18, %v572_v26  ;;  %v533_v37 = vmax.f32 %v531_v15, %v532_v23 }
 0x165   : > { %v540_v34 = vmax.f32 %v538_v19, %v539_v27  ;;  %v553_v35 = vrot.slane %v552_v28, 1  ;;  %v579_v36 = vrot.slane %v578_v29, 2  ;;  %v561_v43 = vmax.f32 %v559_v21, %v560_v31 }
 0x166   : > { %v568_v38 = vmax.f32 %v566_v25, %v567_v32  ;;  %v547_v39 = vmax.f32 %v545_v24, %v546_v30  ;;  %v574_v41 = vrot.slane %v573_v33, 1 }
 0x167   : > { %v554_v40 = vmax.f32 %v552_v28, %v553_v35  ;;  %v580_v42 = vmax.f32 %v578_v29, %v579_v36  ;;  %v583_v44 = vmax.f32 %v533_v37, %v540_v34 }
 0x168   : > { %v585_v47 = vmax.f32 %v561_v43, %v568_v38  ;;  %v575_v48 = vmax.f32 %v573_v33, %v574_v41 }
 0x169   : > { %v581_v45 = vrot.slane %v580_v42, 1  ;;  %v584_v46 = vmax.f32 %v547_v39, %v554_v40 }
 0x16b   : > { %v582_v49 = vmax.f32 %v580_v42, %v581_v45  ;;  %v592_v50 = vsel %vm591_vm1, %v584_v46, %v583_v44 }
 0x16c   : > { %v594_v51 = vsel %vm593_vm2, %v585_v47, %v592_v50 }
 0x16d   : > { %v586_v52 = vmax.f32 %v575_v48, %v582_v49 }
 0x16f   : > { %v596_v53 = vsel %vm595_vm3, %v586_v52, %v594_v51 }
 0x170   : > { %598 = vst [vmem:[%s205_s8] sm:$0xf] %v596_v53 }
 0x171   : > { %893 = shalt.err (!%p890_p7)
}
 0x172   : > { %s894_s22 = scalar_lea.hbm %s1095_s12, 64  ;;  %s898_s28 = scalar_lea.hbm %s1143_s4, 128 }
 0x173   : > { %p895_p8 = scmp.ne.s32.totalorder %s1095_s12, %s894_s22  ;;  %p899_p1 = scmp.lt.u32.totalorder %s1095_s12, %s1143_s4 }
 0x174   : > { %p900_p0 = scmp.lt.u32.totalorder %s898_s28, %s894_s22  ;;  %p902_p6 = scmp.lt.u32.totalorder %s894_s22, %s1095_s12 }
 0x175   : > { %p896_p11 = pnand %p895_p8, %p1154_p9 }
 0x176   : > { %p901_p5 = por %p900_p0, %p899_p1 }
 0x177   : > { %p897_p13 = pneg %p896_p11 }
 0x178   : > { %p903_p10 = por %p902_p6, %p901_p5 }
 0x17a   : > { %p904_p12 = pnand %p903_p10, %p897_p13 }
 0x17c   : > { %907 = shalt.err (!%p904_p12)
}
 0x17d   : > { %802 = dma.vmem_to_hbm [thread:$0]  (%p1154_p9), %s1097_s9, 64, %s1095_s12, %s600_s13  }
 0x17e PF: > { %p814_p2 = scmp.ge.s32.totalorder %s946_s18, 2  ;;  %s625_s5 = sand.u32 1, %s934_s15  }
 0x17f   : > { %p1155_p3 = scmp.ne.s32.totalorder %s1148_s25, 0  ;;  %s626_s6 = scalar_lea.sflag [#allocation4], %s625_s5 }
 0x181   : > { %p809_p4 = pnand %p814_p2, %p1155_p3 }
 0x183   : > { %929 = dma.done.wait (!%p809_p4), %s626_s6, 64  }
 0x184   : > { %931 = vsyncadd (!%p809_p4), %s626_s6, 4294967232  ;;  %p15_p7 = scmp.ge.s32.totalorder %s1004_s20, 4   ;;  %s1156_s15 = smov %s938_s16 }
 0x185   : > { %s1157_s16 = smov %s942_s17  ;;  %s1158_s17 = smov %s1015_s23 }
 0x186   : > { %s1159_s18 = smov %s1004_s20  ;;  %17 = sbr.rel (!%p15_p7) target bundleno = 4 (0x4), region = 76 }
 0x18d   :  { %631 = vsyncpa [#allocation3], 1 }
 0x18e   :  { %633 = vsyncpa [#allocation3 + $0x1], 1 }
 0x18f   :  { %634 = vsyncpa [#allocation4], 1 }
 0x190   :  { %636 = vsyncpa [#allocation4 + $0x1], 1 }

</bundles_post_ra>
